<compile_context>
chip_gen: v5e
topology: v5e:2x2
jax: 0.10.0
libtpu: 0.0.40
codegen_flags: <defaults>
</compile_context>

<pallas_src>
import functools

import jax
import jax.numpy as jnp
from jax.experimental import pallas as pl
from jax.experimental.pallas import tpu as pltpu


def _round_up(x: int, m: int) -> int:
    return (x + m - 1) // m * m


def mlp_kernel(x_ref, w1_ref, b1_ref, w2_ref, b2_ref, o_ref):
    # x_ref : (TB, n_state)          f32   (streamed per grid step)
    # w1_ref: (n_state, H_PAD=128)   f32   (resident)
    # b1_ref: (1, H_PAD)             f32   (resident)
    # w2_ref: (H_PAD, A_PAD=128)     f32   (resident)
    # b2_ref: (1, A_PAD)             f32   (resident)
    # o_ref : (TB, A_PAD)            f32   (lane-dense output tile)
    x = x_ref[...]
    n_state = x.shape[1]

    # fc1 on the VPU: n_state is tiny and static, so an unrolled chain of
    # broadcast multiply-adds keeps everything in one lane-dense (TB, 128)
    # slab and avoids a nearly-all-padding MXU pass.
    acc = x[:, 0:1] * w1_ref[0:1, :]
    for k in range(1, n_state):          # static Python unroll
        acc = acc + x[:, k:k + 1] * w1_ref[k:k + 1, :]
    h = jnp.maximum(acc + b1_ref[...], 0.0)

    # fc2 on the MXU: 128-wide contraction, lane-dense (TB, 128) output.
    y = jnp.dot(h, w2_ref[...], preferred_element_type=jnp.float32)
    o_ref[...] = (y + b2_ref[...]).astype(o_ref.dtype)


@jax.jit
def net_forward(x, w1, b1, w2, b2):
    """Pallas equivalent of Net.forward.

    x : [B, n_state] float32
    w1: [n_state, 10]   (transpose of PyTorch nn.Linear weight)
    b1: [1, 10]
    w2: [10, n_action]
    b2: [1, n_action]
    returns: [B, n_action] float32
    """
    x = x.astype(jnp.float32)
    B, n_state = x.shape
    hidden = w1.shape[1]
    n_action = w2.shape[1]

    # Lane-dense padded feature dims (exact: padded weight rows/cols are zero).
    H_PAD = _round_up(hidden, 128)
    A_PAD = _round_up(n_action, 128)

    # Batch tiling: TB up to 512 rows, batch padded to a multiple of TB.
    TB = min(512, _round_up(B, 8))
    B_pad = _round_up(B, TB)
    grid = (B_pad // TB,)

    xp = jnp.pad(x, ((0, B_pad - B), (0, 0)))
    w1p = jnp.pad(w1.astype(jnp.float32), ((0, 0), (0, H_PAD - hidden)))
    b1p = jnp.pad(b1.astype(jnp.float32), ((0, 0), (0, H_PAD - hidden)))
    w2p = jnp.pad(w2.astype(jnp.float32),
                  ((0, H_PAD - hidden), (0, A_PAD - n_action)))
    b2p = jnp.pad(b2.astype(jnp.float32), ((0, 0), (0, A_PAD - n_action)))

    out_padded = pl.pallas_call(
        mlp_kernel,
        out_shape=jax.ShapeDtypeStruct((B_pad, A_PAD), jnp.float32),
        grid=grid,
        in_specs=[
            pl.BlockSpec((TB, n_state), lambda i: (i, 0)),      # x: streamed
            pl.BlockSpec((n_state, H_PAD), lambda i: (0, 0)),   # w1: resident
            pl.BlockSpec((1, H_PAD), lambda i: (0, 0)),         # b1: resident
            pl.BlockSpec((H_PAD, A_PAD), lambda i: (0, 0)),     # w2: resident
            pl.BlockSpec((1, A_PAD), lambda i: (0, 0)),         # b2: resident
        ],
        out_specs=pl.BlockSpec((TB, A_PAD), lambda i: (i, 0)),
        compiler_params=pltpu.CompilerParams(
            dimension_semantics=("parallel",),
            vmem_limit_bytes=32 * 1024 * 1024,
        ),
    )(xp, w1p, b1p, w2p, b2p)

    return out_padded[:B, :n_action]


def init_params(key, n_state, n_action):
    """Deterministic init mirroring Net.__init__:
    weights ~ Normal(0, 0.1); biases use PyTorch Linear default
    Uniform(-1/sqrt(fan_in), 1/sqrt(fan_in))."""
    k1, k2, k3, k4 = jax.random.split(key, 4)
    hidden = 10
    w1 = 0.1 * jax.random.normal(k1, (n_state, hidden), dtype=jnp.float32)
    b1 = jax.random.uniform(k2, (1, hidden), dtype=jnp.float32,
                            minval=-1.0 / jnp.sqrt(n_state),
                            maxval=1.0 / jnp.sqrt(n_state))
    w2 = 0.1 * jax.random.normal(k3, (hidden, n_action), dtype=jnp.float32)
    b2 = jax.random.uniform(k4, (1, n_action), dtype=jnp.float32,
                            minval=-1.0 / jnp.sqrt(hidden),
                            maxval=1.0 / jnp.sqrt(hidden))
    return w1, b1, w2, b2


def _reference(x, w1, b1, w2, b2):
    return jnp.maximum(x @ w1 + b1, 0.0) @ w2 + b2


if __name__ == "__main__":
    key = jax.random.PRNGKey(0)
    kx, kx2, kp = jax.random.split(key, 3)

    n_state = 4
    n_action = 2
    w1, b1, w2, b2 = init_params(kp, n_state, n_action)

    # Small-batch case (single grid step).
    batch = 8
    x = jax.random.normal(kx, (batch, n_state), dtype=jnp.float32)
    out = jax.block_until_ready(net_forward(x, w1, b1, w2, b2))
    ref = _reference(x, w1, b1, w2, b2)
    assert out.shape == (batch, n_action)
    assert jnp.allclose(out, ref, atol=1e-5, rtol=1e-5)

    # Larger batch exercising the batch grid (TB=512, 2 tiles) + row padding.
    batch2 = 520
    x2 = jax.random.normal(kx2, (batch2, n_state), dtype=jnp.float32)
    out2 = jax.block_until_ready(net_forward(x2, w1, b1, w2, b2))
    ref2 = _reference(x2, w1, b1, w2, b2)
    assert out2.shape == (batch2, n_action)
    assert jnp.allclose(out2, ref2, atol=1e-5, rtol=1e-5)

    print("KERNEL_OK")
</pallas_src>

<mosaic_0001>
module attributes {stable_mosaic.version = 11 : i64} {
  func.func @mlp_kernel(%arg0: i32, %arg1: memref<8x4xf32, #tpu.memory_space<vmem>>, %arg2: memref<4x128xf32, #tpu.memory_space<vmem>>, %arg3: memref<1x128xf32, #tpu.memory_space<vmem>>, %arg4: memref<128x128xf32, #tpu.memory_space<vmem>>, %arg5: memref<1x128xf32, #tpu.memory_space<vmem>>, %arg6: memref<8x128xf32, #tpu.memory_space<vmem>>) attributes {dimension_semantics = [#tpu.dimension_semantics<parallel>], iteration_bounds = array<i64: 1>, scalar_prefetch = 0 : i64, scratch_operands = 0 : i64, tpu.core_type = #tpu.core_type<tc>, window_params = [{transform_indices = @transform_0, window_bounds = array<i64: 8, 4>}, {pipeline_mode = #tpu.pipeline_mode<synchronous>, transform_indices = @transform_1, window_bounds = array<i64: 4, 128>}, {pipeline_mode = #tpu.pipeline_mode<synchronous>, transform_indices = @transform_2, window_bounds = array<i64: 1, 128>}, {pipeline_mode = #tpu.pipeline_mode<synchronous>, transform_indices = @transform_3, window_bounds = array<i64: 128, 128>}, {pipeline_mode = #tpu.pipeline_mode<synchronous>, transform_indices = @transform_4, window_bounds = array<i64: 1, 128>}, {transform_indices = @transform_5, window_bounds = array<i64: 8, 128>}]} {
    %c0 = arith.constant 0 : index
    %c0_0 = arith.constant 0 : index
    %0 = vector.load %arg1[%c0, %c0_0] : memref<8x4xf32, #tpu.memory_space<vmem>>, vector<8x4xf32>
    %1 = vector.extract_strided_slice %0 {offsets = [0, 0], sizes = [8, 1], strides = [1, 1]} : vector<8x4xf32> to vector<8x1xf32>
    %c0_1 = arith.constant 0 : index
    %c0_2 = arith.constant 0 : index
    %2 = vector.load %arg2[%c0_1, %c0_2] : memref<4x128xf32, #tpu.memory_space<vmem>>, vector<1x128xf32>
    %3 = vector.broadcast %1 : vector<8x1xf32> to vector<8x128xf32>
    %4 = vector.broadcast %2 : vector<1x128xf32> to vector<8x128xf32>
    %5 = arith.mulf %3, %4 : vector<8x128xf32>
    %6 = vector.extract_strided_slice %0 {offsets = [0, 1], sizes = [8, 1], strides = [1, 1]} : vector<8x4xf32> to vector<8x1xf32>
    %c1 = arith.constant 1 : index
    %c0_3 = arith.constant 0 : index
    %7 = vector.load %arg2[%c1, %c0_3] : memref<4x128xf32, #tpu.memory_space<vmem>>, vector<1x128xf32>
    %8 = vector.broadcast %6 : vector<8x1xf32> to vector<8x128xf32>
    %9 = vector.broadcast %7 : vector<1x128xf32> to vector<8x128xf32>
    %10 = arith.mulf %8, %9 : vector<8x128xf32>
    %11 = arith.addf %5, %10 : vector<8x128xf32>
    %12 = vector.extract_strided_slice %0 {offsets = [0, 2], sizes = [8, 1], strides = [1, 1]} : vector<8x4xf32> to vector<8x1xf32>
    %c2 = arith.constant 2 : index
    %c0_4 = arith.constant 0 : index
    %13 = vector.load %arg2[%c2, %c0_4] : memref<4x128xf32, #tpu.memory_space<vmem>>, vector<1x128xf32>
    %14 = vector.broadcast %12 : vector<8x1xf32> to vector<8x128xf32>
    %15 = vector.broadcast %13 : vector<1x128xf32> to vector<8x128xf32>
    %16 = arith.mulf %14, %15 : vector<8x128xf32>
    %17 = arith.addf %11, %16 : vector<8x128xf32>
    %18 = vector.extract_strided_slice %0 {offsets = [0, 3], sizes = [8, 1], strides = [1, 1]} : vector<8x4xf32> to vector<8x1xf32>
    %c3 = arith.constant 3 : index
    %c0_5 = arith.constant 0 : index
    %19 = vector.load %arg2[%c3, %c0_5] : memref<4x128xf32, #tpu.memory_space<vmem>>, vector<1x128xf32>
    %20 = vector.broadcast %18 : vector<8x1xf32> to vector<8x128xf32>
    %21 = vector.broadcast %19 : vector<1x128xf32> to vector<8x128xf32>
    %22 = arith.mulf %20, %21 : vector<8x128xf32>
    %23 = arith.addf %17, %22 : vector<8x128xf32>
    %c0_6 = arith.constant 0 : index
    %c0_7 = arith.constant 0 : index
    %24 = vector.load %arg3[%c0_6, %c0_7] : memref<1x128xf32, #tpu.memory_space<vmem>>, vector<1x128xf32>
    %25 = vector.broadcast %24 : vector<1x128xf32> to vector<8x128xf32>
    %26 = arith.addf %23, %25 : vector<8x128xf32>
    %cst = arith.constant 0.000000e+00 : f32
    %27 = vector.broadcast %cst : f32 to vector<8x128xf32>
    %28 = arith.maximumf %26, %27 : vector<8x128xf32>
    %c0_8 = arith.constant 0 : index
    %c0_9 = arith.constant 0 : index
    %29 = vector.load %arg4[%c0_8, %c0_9] : memref<128x128xf32, #tpu.memory_space<vmem>>, vector<128x128xf32>
    %cst_10 = arith.constant dense<0.000000e+00> : vector<8x128xf32>
    %30 = tpu.matmul %28, %29, %cst_10 {dimension_numbers = #tpu.dot_dimension_numbers<[1], [0], [0], [1], [0, 0, 1, 1], [], []>} : vector<8x128xf32>, vector<128x128xf32>, vector<8x128xf32> -> vector<8x128xf32>
    %c0_11 = arith.constant 0 : index
    %c0_12 = arith.constant 0 : index
    %31 = vector.load %arg5[%c0_11, %c0_12] : memref<1x128xf32, #tpu.memory_space<vmem>>, vector<1x128xf32>
    %32 = vector.broadcast %31 : vector<1x128xf32> to vector<8x128xf32>
    %33 = arith.addf %30, %32 : vector<8x128xf32>
    %c0_13 = arith.constant 0 : index
    %c0_14 = arith.constant 0 : index
    %34 = vector.load %arg6[%c0_13, %c0_14] : memref<8x128xf32, #tpu.memory_space<vmem>>, vector<8x128xf32>
    tpu.vector_store %arg6[%c0_13, %c0_14], %33 {strides = array<i32>} : memref<8x128xf32, #tpu.memory_space<vmem>>, vector<8x128xf32>,
    return
  }
  func.func @transform_0(%arg0: i32) -> (i32, i32) {
    %c0_i32 = arith.constant 0 : i32
    %c0_i32_0 = arith.constant 0 : i32
    return %arg0, %c0_i32 : i32, i32
  }
  func.func @transform_1(%arg0: i32) -> (i32, i32) {
    %c0_i32 = arith.constant 0 : i32
    %c0_i32_0 = arith.constant 0 : i32
    %c0_i32_1 = arith.constant 0 : i32
    return %c0_i32, %c0_i32_0 : i32, i32
  }
  func.func @transform_2(%arg0: i32) -> (i32, i32) {
    %c0_i32 = arith.constant 0 : i32
    %c0_i32_0 = arith.constant 0 : i32
    %c0_i32_1 = arith.constant 0 : i32
    return %c0_i32, %c0_i32_0 : i32, i32
  }
  func.func @transform_3(%arg0: i32) -> (i32, i32) {
    %c0_i32 = arith.constant 0 : i32
    %c0_i32_0 = arith.constant 0 : i32
    %c0_i32_1 = arith.constant 0 : i32
    return %c0_i32, %c0_i32_0 : i32, i32
  }
  func.func @transform_4(%arg0: i32) -> (i32, i32) {
    %c0_i32 = arith.constant 0 : i32
    %c0_i32_0 = arith.constant 0 : i32
    %c0_i32_1 = arith.constant 0 : i32
    return %c0_i32, %c0_i32_0 : i32, i32
  }
  func.func @transform_5(%arg0: i32) -> (i32, i32) {
    %c0_i32 = arith.constant 0 : i32
    %c0_i32_0 = arith.constant 0 : i32
    return %arg0, %c0_i32 : i32, i32
  }
}

</mosaic_0001>

<bundles_post_ra>
// kernel: net_forward.1
= control target key start
LH: loop header
LB: loop body
LE: loop exit
PB: predicated region body
PF: predicated region fallthrough
CT: control target
= control target key end

     0   :  { %v119_v0 = vmov 0   ;;  %v120_v2 = vmov 2   ;;  %v121_v8 = vmov 1   ;;  %v122_v9 = vmov 3   ;;  %s225_s0 = inlined_call_operand.vmem [shape: f32[8,4], index: 0, kind: input, shape index: {}]   ;;  %s226_s3 = inlined_call_operand.vmem [shape: f32[128,128], index: 3, kind: input, shape index: {}]   ;;  %s227_s1 = inlined_call_operand.vmem [shape: f32[4,128], index: 1, kind: input, shape index: {}]   ;;  %s228_s2 = inlined_call_operand.vmem [shape: f32[1,128], index: 2, kind: input, shape index: {}]   ;;  %s229_s4 = inlined_call_operand.vmem [shape: f32[1,128], index: 4, kind: input, shape index: {}]   ;;  %s230_s5 = inlined_call_operand.vmem [shape: f32[8,128], index: 5, kind: output, shape index: {}]  }
   0x1   :  { %108 = vset.pattern.permute.xlu0 %v119_v0  ;;  %v20_v1 = vld [vmem:[%s225_s0] sm:$0xff]  ;;  %110 = vset.pattern.permute.xlu1 %v120_v2  ;;  %v74_v3 = vld [vmem:[%s226_s3 + $0x78] sm:$0xff]  ;;  %v73_v4 = vld [vmem:[%s226_s3 + $0x70] sm:$0xff] }
   0x2   :  { %24 = vperm.xlu0 %108, %v20_v1   ;;  %39 = vperm.xlu1 %110, %v20_v1   ;;  %v72_v5 = vld [vmem:[%s226_s3 + $0x68] sm:$0xff]  ;;  %v71_v6 = vld [vmem:[%s226_s3 + $0x60] sm:$0xff]  ;;  %v70_v7 = vld [vmem:[%s226_s3 + $0x58] sm:$0xff] }
   0x3   :  { %79 = vmatpush.msra.mxu0 %v74_v3  ;;  %v69_v10 = vld [vmem:[%s226_s3 + $0x50] sm:$0xff]  ;;  %v68_v11 = vld [vmem:[%s226_s3 + $0x48] sm:$0xff]  ;;  %v67_v12 = vld [vmem:[%s226_s3 + $0x40] sm:$0xff] }
   0x4   :  { %v66_v13 = vld [vmem:[%s226_s3 + $0x38] sm:$0xff]  ;;  %v65_v14 = vld [vmem:[%s226_s3 + $0x30] sm:$0xff]  ;;  %v64_v15 = vld [vmem:[%s226_s3 + $0x28] sm:$0xff] }
   0x5   :  { %80 = vmatpush.msra.mxu0 %v73_v4  ;;  %v63_v16 = vld [vmem:[%s226_s3 + $0x20] sm:$0xff]  ;;  %v62_v17 = vld [vmem:[%s226_s3 + $0x18] sm:$0xff]  ;;  %v61_v18 = vld [vmem:[%s226_s3 + $0x10] sm:$0xff] }
   0x6   :  { %v60_v19 = vld [vmem:[%s226_s3 + $0x8] sm:$0xff]  ;;  %v59_v20 = vld [vmem:[%s226_s3] sm:$0xff] }
   0x7   :  { %81 = vmatpush.msra.mxu0 %v72_v5  ;;  %v113_v23 = vld [vmem:[%s227_s1] ss:$0 sm:$0xff]  ;;  %v115_v24 = vld [vmem:[%s227_s1 + $0x1] ss:$0 sm:$0xff]  ;;  %v114_v25 = vld [vmem:[%s227_s1 + $0x2] ss:$0 sm:$0xff] }
   0x8   :  { %v116_v26 = vld [vmem:[%s227_s1 + $0x3] ss:$0 sm:$0xff]  ;;  %v117_v35 = vld [vmem:[%s228_s2] ss:$0 sm:$0xff] }
   0x9   :  { %82 = vmatpush.msra.mxu0 %v71_v6  ;;  %v118_v39 = vld [vmem:[%s229_s4] ss:$0 sm:$0xff] }
   0xa   :  { %109 = vset.pattern.permute.xlu0 %v121_v8  ;;  %111 = vset.pattern.permute.xlu1 %v122_v9 }
   0xb   :  { %31 = vperm.xlu0 %109, %v20_v1   ;;  %47 = vperm.xlu1 %111, %v20_v1  }
   0xc   :  { %83 = vmatpush.msra.mxu0 %v70_v7 }
   0xe   :  { %84 = vmatpush.msra.mxu0 %v69_v10 }
  0x10   :  { %85 = vmatpush.msra.mxu0 %v68_v11 }
  0x12   :  { %86 = vmatpush.msra.mxu0 %v67_v12 }
  0x13   :  { %112 = vset.pattern.permute.xlu0 %v122_v9 }
  0x14   :  { %87 = vmatpush.msra.mxu0 %v66_v13 }
  0x16   :  { %88 = vmatpush.msra.mxu0 %v65_v14 }
  0x18   :  { %89 = vmatpush.msra.mxu0 %v64_v15 }
  0x1a   :  { %90 = vmatpush.msra.mxu0 %v63_v16 }
  0x1c   :  { %91 = vmatpush.msra.mxu0 %v62_v17 }
  0x1e   :  { %92 = vmatpush.msra.mxu0 %v61_v18 }
  0x20   :  { %93 = vmatpush.msra.mxu0 %v60_v19 }
  0x22   :  { %94 = vmatpush.msra.mxu0 %v59_v20 }
  0x74   :  { %v25_v21 = vpop.permute.xlu0 %24  ;;  %v40_v22 = vpop.permute.xlu1 %39 }
  0x75   :  { %v28_v29 = vmul.f32 %v113_v23, %v25_v21  ;;  %v43_v31 = vmul.f32 %v114_v25, %v40_v22 }
  0x7d   :  { %v32_v27 = vpop.permute.xlu0 %31  ;;  %v48_v28 = vpop.permute.xlu1 %47 }
  0x7e   :  { %v35_v30 = vmul.f32 %v115_v24, %v32_v27  ;;  %v51_v33 = vmul.f32 %v116_v26, %v48_v28 }
  0x80   :  { %v36_v32 = vadd.f32 %v35_v30, %v28_v29 }
  0x82   :  { %v44_v34 = vadd.f32 %v43_v31, %v36_v32 }
  0x84   :  { %v52_v36 = vadd.f32 %v51_v33, %v44_v34 }
  0x86   :  { %v57_v37 = vadd.f32 %v117_v35, %v52_v36 }
  0x88   :  { %v58_v38 = vmax.f32 %v57_v37, 0.0 }
  0x8a   :  { %95 = vmatmul.f32.vlgmr.msra.gmra.mxu0 %v58_v38 }
 0x107   :  { %v96_v40 = vpop.f32.mrf.mxu0 }
 0x108   :  { %v97_v41 = vadd.f32 %v118_v39, %v96_v40 }
 0x10a   :  { %99 = vst [vmem:[%s230_s5] sm:$0xff] %v97_v41 }

</bundles_post_ra>
